<compile_context>
chip_gen: v6e
topology: v6e:2x2x1
jax: 0.10.0
libtpu: 0.0.40
codegen_flags: <defaults>
</compile_context>

<pallas_src>
import functools

import jax
import jax.numpy as jnp
from jax.experimental import pallas as pl
from jax.experimental.pallas import tpu as pltpu


# ---------------------------------------------------------------------------
# Pallas kernels
# ---------------------------------------------------------------------------
def _sym_A_kernel(a_ref, w_ref, brow_ref, bcol_ref, o_ref, *, no_A):
    """Fused symmetric lin_B transform for one batch element.

    a_ref: (1, n, no_A, n), w_ref: (N1, n), brow_ref: (1, N1), bcol_ref: (N1, 1),
    o_ref: (1, no_A, N1, N1).
    """
    w = w_ref[...]                       # (N1, n)
    brow = brow_ref[...]                 # (1, N1)
    bcol = bcol_ref[...]                 # (N1, 1)
    a_b = a_ref[0]                       # (n, no_A, n)
    # no_A is small and static; for large no_A this loop would become a grid axis.
    for c in range(no_A):
        a_c = a_b[:, c, :]               # (n, n)  == A[b, :, c, :]
        # First lin_B (transposed): y1t[j, i] = sum_k W_B[j,k] * A[b,i,c,k] + b_B[j]
        y1t = jax.lax.dot_general(
            w, a_c, (((1,), (1,)), ((), ())), preferred_element_type=jnp.float32
        ) + bcol                          # (N1, n)
        # Second lin_B: z[j, j2] = sum_i y1t[j,i] * W_B[j2,i] + b_B[j2]
        z = jax.lax.dot_general(
            y1t, w, (((1,), (1,)), ((), ())), preferred_element_type=jnp.float32
        ) + brow                          # (N1, N1)
        o_ref[0, c] = z.astype(o_ref.dtype)


def _lin_V_kernel(v_ref, w_ref, bcol_ref, o_ref, stats_ref, *, apply_relu):
    """result_V[b] = relu(W_A @ V[b] + b_A); also emits per-batch BN partial stats.

    v_ref: (1, n, F), w_ref: (N1, n), bcol_ref: (N1, 1),
    o_ref: (1, N1, F), stats_ref: (1, 2, F)  -> [sum, sum_sq] over the N1 rows.
    """
    v = v_ref[0]                          # (n, F)
    y = jax.lax.dot_general(
        w_ref[...], v, (((1,), (0,)), ((), ())), preferred_element_type=jnp.float32
    ) + bcol_ref[...]                     # (N1, F)
    if apply_relu:
        y = jnp.maximum(y, 0.0)
    o_ref[0] = y.astype(o_ref.dtype)
    s1 = jnp.sum(y, axis=0, keepdims=True)        # (1, F)
    s2 = jnp.sum(y * y, axis=0, keepdims=True)    # (1, F)
    stats_ref[0] = jnp.concatenate([s1, s2], axis=0)


def _bn_apply_kernel(x_ref, mean_ref, inv_ref, o_ref):
    # x_ref: (1, N1, F); mean_ref, inv_ref: (1, F)
    o_ref[0] = (x_ref[0] - mean_ref[...]) * inv_ref[...]


# ---------------------------------------------------------------------------
# Wrappers
# ---------------------------------------------------------------------------
def sym_A_transform(A, W_B, b_B):
    """Fused  lin_B -> regroup -> lin_B  of the A path. Returns (B, N1, no_A, N1)."""
    B, n, no_A, _ = A.shape
    N1 = W_B.shape[0]
    brow = b_B.reshape(1, N1).astype(jnp.float32)
    bcol = b_B.reshape(N1, 1).astype(jnp.float32)
    kern = functools.partial(_sym_A_kernel, no_A=no_A)
    flops = 2 * B * no_A * (n * n * N1 + n * N1 * N1)
    bytes_accessed = 4 * (A.size + W_B.size + 2 * N1 + B * no_A * N1 * N1)
    # TODO(synk): for very large n (e.g. n>=1024 on v7x's 64 MiB VMEM) the (1,n,no_A,n)
    # block should gain an n-tiling grid axis or a vmem_limit_bytes override.
    out = pl.pallas_call(
        kern,
        out_shape=jax.ShapeDtypeStruct((B, no_A, N1, N1), jnp.float32),
        grid=(B,),
        in_specs=[
            pl.BlockSpec((1, n, no_A, n), lambda b: (b, 0, 0, 0)),
            pl.BlockSpec((N1, n), lambda b: (0, 0)),
            pl.BlockSpec((1, N1), lambda b: (0, 0)),
            pl.BlockSpec((N1, 1), lambda b: (0, 0)),
        ],
        out_specs=pl.BlockSpec((1, no_A, N1, N1), lambda b: (b, 0, 0, 0)),
        compiler_params=pltpu.CompilerParams(dimension_semantics=("parallel",)),
        cost_estimate=pl.CostEstimate(
            flops=flops, transcendentals=0, bytes_accessed=bytes_accessed),
    )(A.astype(jnp.float32), W_B.astype(jnp.float32), brow, bcol)
    # Row-major metadata-only reshape; equivalent to the module's
    # .view(B, -1, N1).view(B, N1, no_A, N1) sequence (no data movement).
    return out.reshape(B, N1, no_A, N1)


def lin_V_with_stats(V, W_A, b_A, *, relu=True):
    """(B, N1, F) = relu(W_A @ V[b] + b_A) per batch, plus (B, 2, F) BN partial stats."""
    B, n, F = V.shape
    N1 = W_A.shape[0]
    bcol = b_A.reshape(N1, 1).astype(jnp.float32)
    kern = functools.partial(_lin_V_kernel, apply_relu=relu)
    flops = 2 * B * N1 * n * F
    bytes_accessed = 4 * (V.size + W_A.size + N1 + B * N1 * F + B * 2 * F)
    rV, partial_stats = pl.pallas_call(
        kern,
        out_shape=(
            jax.ShapeDtypeStruct((B, N1, F), jnp.float32),
            jax.ShapeDtypeStruct((B, 2, F), jnp.float32),
        ),
        grid=(B,),
        in_specs=[
            pl.BlockSpec((1, n, F), lambda b: (b, 0, 0)),
            pl.BlockSpec((N1, n), lambda b: (0, 0)),
            pl.BlockSpec((N1, 1), lambda b: (0, 0)),
        ],
        out_specs=(
            pl.BlockSpec((1, N1, F), lambda b: (b, 0, 0)),
            pl.BlockSpec((1, 2, F), lambda b: (b, 0, 0)),
        ),
        compiler_params=pltpu.CompilerParams(dimension_semantics=("parallel",)),
        cost_estimate=pl.CostEstimate(
            flops=flops, transcendentals=0, bytes_accessed=bytes_accessed),
    )(V.astype(jnp.float32), W_A.astype(jnp.float32), bcol)
    return rV, partial_stats


def bn_apply(x, mean, inv):
    """x: (B, N1, F); mean, inv: (F,). Returns (x - mean) * inv."""
    B, N1, F = x.shape
    mean2 = mean.reshape(1, F).astype(jnp.float32)
    inv2 = inv.reshape(1, F).astype(jnp.float32)
    return pl.pallas_call(
        _bn_apply_kernel,
        out_shape=jax.ShapeDtypeStruct((B, N1, F), jnp.float32),
        grid=(B,),
        in_specs=[
            pl.BlockSpec((1, N1, F), lambda b: (b, 0, 0)),
            pl.BlockSpec((1, F), lambda b: (0, 0)),
            pl.BlockSpec((1, F), lambda b: (0, 0)),
        ],
        out_specs=pl.BlockSpec((1, N1, F), lambda b: (b, 0, 0)),
        compiler_params=pltpu.CompilerParams(dimension_semantics=("parallel",)),
        cost_estimate=pl.CostEstimate(
            flops=2 * B * N1 * F, transcendentals=0,
            bytes_accessed=4 * (2 * B * N1 * F + 2 * F)),
    )(x.astype(jnp.float32), mean2, inv2)


# ---------------------------------------------------------------------------
# Module forward
# ---------------------------------------------------------------------------
def global_average_pooling_sym(A, V, params, *, is_relu=True, is_bn=True, eps=1e-5):
    W_A, b_A, W_B, b_B = params["W_A"], params["b_A"], params["W_B"], params["b_B"]

    # ---- result_A: both lin_B applications fused in one kernel ----
    result_A = sym_A_transform(A, W_B, b_B)

    # ---- result_V: lin_A over the node axis (+fused ReLU, +fused BN partial stats) ----
    rV, partial_stats = lin_V_with_stats(V, W_A, b_A, relu=is_relu)
    if is_bn:
        B_, N1_, F_ = rV.shape
        count = float(B_ * N1_)
        totals = jnp.sum(partial_stats, axis=0)            # (2, F) -- tiny reduction
        mean = totals[0] / count
        var = jnp.maximum(totals[1] / count - mean * mean, 0.0)  # biased variance (training norm)
        inv = jax.lax.rsqrt(var + eps)
        # TODO(synk): nn.BatchNorm1d running_mean/running_var buffer updates are not modeled;
        # normalization itself uses batch statistics, matching the training-mode forward output.
        rV = bn_apply(rV, mean, inv)
    return result_A, rV


# ---------------------------------------------------------------------------
# Pure-JAX reference for correctness check (mirrors the PyTorch ops 1:1)
# ---------------------------------------------------------------------------
def reference_forward(A, V, params, *, is_relu=True, is_bn=True, eps=1e-5):
    W_A, b_A, W_B, b_B = params["W_A"], params["b_A"], params["W_B"], params["b_B"]
    B = A.shape[0]
    n = A.shape[-1]
    N1 = W_B.shape[0]
    lin = lambda x, W, b: jnp.einsum("bmk,nk->bmn", x, W) + b
    rA = A.reshape(B, -1, n).astype(jnp.float32)
    rA = lin(rA, W_B, b_B)
    rA = rA.reshape(B, n, -1)
    rA = jnp.swapaxes(rA, 1, 2)
    rA = lin(rA, W_B, b_B)
    rA = rA.reshape(B, N1, A.shape[2], N1)

    rV = lin(jnp.swapaxes(V, 1, 2), W_A, b_A)
    rV = jnp.swapaxes(rV, 1, 2)
    if is_relu:
        rV = jnp.maximum(rV, 0.0)
    if is_bn:
        x = jnp.swapaxes(rV, 1, 2)                         # (B, F, N1)
        mean = jnp.mean(x, axis=(0, 2), keepdims=True)
        var = jnp.mean(jnp.square(x - mean), axis=(0, 2), keepdims=True)
        x = (x - mean) * jax.lax.rsqrt(var + eps)
        rV = jnp.swapaxes(x, 1, 2)
    return rA, rV


# ---------------------------------------------------------------------------
# Deterministic parameter init (shapes from the module's __init__)
# ---------------------------------------------------------------------------
def init_params(key, input_nodes_V, input_features_V, output_features_V):
    kA, kB = jax.random.split(key)
    std = 1.0 / (input_features_V ** 0.5)
    W_A = std * jax.random.normal(kA, (output_features_V, input_nodes_V), jnp.float32)
    W_B = std * jax.random.normal(kB, (output_features_V, input_nodes_V), jnp.float32)
    b_A = jnp.full((output_features_V,), 0.1, jnp.float32)
    b_B = jnp.full((output_features_V,), 0.1, jnp.float32)
    return {"W_A": W_A, "b_A": b_A, "W_B": W_B, "b_B": b_B}


if __name__ == "__main__":
    batch = 2
    input_nodes_V = 16      # n  (last dim of A, node axis of V)
    input_features_V = 8    # F  (BatchNorm1d channels)
    output_features_V = 8   # N1
    no_A = 3                # adjacency channels (A.shape[2])

    key = jax.random.PRNGKey(0)
    kp, kA, kV = jax.random.split(key, 3)
    params = init_params(kp, input_nodes_V, input_features_V, output_features_V)

    A = jax.random.normal(kA, (batch, input_nodes_V, no_A, input_nodes_V), jnp.float32)
    V = jax.random.normal(kV, (batch, input_nodes_V, input_features_V), jnp.float32)

    result_A, result_V = global_average_pooling_sym(A, V, params, is_relu=True, is_bn=True)
    result_A = jax.block_until_ready(result_A)
    result_V = jax.block_until_ready(result_V)

    ref_A, ref_V = reference_forward(A, V, params, is_relu=True, is_bn=True)

    assert result_A.shape == (batch, output_features_V, no_A, output_features_V)
    assert result_V.shape == (batch, output_features_V, input_features_V)
    assert jnp.allclose(result_A, ref_A, atol=1e-4, rtol=1e-4)
    assert jnp.allclose(result_V, ref_V, atol=1e-4, rtol=1e-4)

    print("KERNEL_OK")
</pallas_src>

<mosaic_0001>
module attributes {stable_mosaic.version = 11 : i64} {
  func.func @_sym_A_kernel(%arg0: i32, %arg1: memref<1x16x3x16xf32, #tpu.memory_space<vmem>>, %arg2: memref<8x16xf32, #tpu.memory_space<vmem>>, %arg3: memref<1x8xf32, #tpu.memory_space<vmem>>, %arg4: memref<8x1xf32, #tpu.memory_space<vmem>>, %arg5: memref<1x3x8x8xf32, #tpu.memory_space<vmem>>) attributes {dimension_semantics = [#tpu.dimension_semantics<parallel>], iteration_bounds = array<i64: 2>, scalar_prefetch = 0 : i64, scratch_operands = 0 : i64, tpu.core_type = #tpu.core_type<tc>, window_params = [{transform_indices = @transform_0, window_bounds = array<i64: 1, 16, 3, 16>}, {pipeline_mode = #tpu.pipeline_mode<synchronous>, transform_indices = @transform_1, window_bounds = array<i64: 8, 16>}, {pipeline_mode = #tpu.pipeline_mode<synchronous>, transform_indices = @transform_2, window_bounds = array<i64: 1, 8>}, {pipeline_mode = #tpu.pipeline_mode<synchronous>, transform_indices = @transform_3, window_bounds = array<i64: 8, 1>}, {transform_indices = @transform_4, window_bounds = array<i64: 1, 3, 8, 8>}]} {
    %c0 = arith.constant 0 : index
    %c0_0 = arith.constant 0 : index
    %0 = vector.load %arg2[%c0, %c0_0] : memref<8x16xf32, #tpu.memory_space<vmem>>, vector<8x16xf32>
    %c0_1 = arith.constant 0 : index
    %c0_2 = arith.constant 0 : index
    %1 = vector.load %arg3[%c0_1, %c0_2] : memref<1x8xf32, #tpu.memory_space<vmem>>, vector<1x8xf32>
    %c0_3 = arith.constant 0 : index
    %c0_4 = arith.constant 0 : index
    %2 = vector.load %arg4[%c0_3, %c0_4] : memref<8x1xf32, #tpu.memory_space<vmem>>, vector<8x1xf32>
    %c0_5 = arith.constant 0 : index
    %c0_6 = arith.constant 0 : index
    %c0_7 = arith.constant 0 : index
    %c0_8 = arith.constant 0 : index
    %3 = vector.load %arg1[%c0_5, %c0_6, %c0_7, %c0_8] : memref<1x16x3x16xf32, #tpu.memory_space<vmem>>, vector<1x16x3x16xf32>
    %4 = vector.shape_cast %3 : vector<1x16x3x16xf32> to vector<16x3x16xf32>
    %5 = vector.extract_strided_slice %4 {offsets = [0, 0, 0], sizes = [16, 1, 16], strides = [1, 1, 1]} : vector<16x3x16xf32> to vector<16x1x16xf32>
    %6 = vector.shape_cast %5 : vector<16x1x16xf32> to vector<16x16xf32>
    %cst = arith.constant dense<0.000000e+00> : vector<8x16xf32>
    %7 = tpu.matmul %0, %6, %cst {dimension_numbers = #tpu.dot_dimension_numbers<[1], [1], [0], [0], [0, 0, 1, 0], [], []>} : vector<8x16xf32>, vector<16x16xf32>, vector<8x16xf32> -> vector<8x16xf32>
    %8 = vector.broadcast %2 : vector<8x1xf32> to vector<8x16xf32>
    %9 = arith.addf %7, %8 : vector<8x16xf32>
    %cst_9 = arith.constant dense<0.000000e+00> : vector<8x8xf32>
    %10 = tpu.matmul %9, %0, %cst_9 {dimension_numbers = #tpu.dot_dimension_numbers<[1], [1], [0], [0], [0, 0, 1, 0], [], []>} : vector<8x16xf32>, vector<8x16xf32>, vector<8x8xf32> -> vector<8x8xf32>
    %11 = vector.broadcast %1 : vector<1x8xf32> to vector<8x8xf32>
    %12 = arith.addf %10, %11 : vector<8x8xf32>
    %c0_10 = arith.constant 0 : index
    %c0_11 = arith.constant 0 : index
    %c0_12 = arith.constant 0 : index
    %c0_13 = arith.constant 0 : index
    %13 = vector.load %arg5[%c0_10, %c0_11, %c0_12, %c0_13] : memref<1x3x8x8xf32, #tpu.memory_space<vmem>>, vector<1x1x8x8xf32>
    %14 = vector.shape_cast %13 : vector<1x1x8x8xf32> to vector<8x8xf32>
    %15 = vector.shape_cast %12 : vector<8x8xf32> to vector<1x1x8x8xf32>
    tpu.vector_store %arg5[%c0_10, %c0_11, %c0_12, %c0_13], %15 {strides = array<i32>} : memref<1x3x8x8xf32, #tpu.memory_space<vmem>>, vector<1x1x8x8xf32>,
    %16 = vector.extract_strided_slice %4 {offsets = [0, 1, 0], sizes = [16, 1, 16], strides = [1, 1, 1]} : vector<16x3x16xf32> to vector<16x1x16xf32>
    %17 = vector.shape_cast %16 : vector<16x1x16xf32> to vector<16x16xf32>
    %cst_14 = arith.constant dense<0.000000e+00> : vector<8x16xf32>
    %18 = tpu.matmul %0, %17, %cst_14 {dimension_numbers = #tpu.dot_dimension_numbers<[1], [1], [0], [0], [0, 0, 1, 0], [], []>} : vector<8x16xf32>, vector<16x16xf32>, vector<8x16xf32> -> vector<8x16xf32>
    %19 = vector.broadcast %2 : vector<8x1xf32> to vector<8x16xf32>
    %20 = arith.addf %18, %19 : vector<8x16xf32>
    %cst_15 = arith.constant dense<0.000000e+00> : vector<8x8xf32>
    %21 = tpu.matmul %20, %0, %cst_15 {dimension_numbers = #tpu.dot_dimension_numbers<[1], [1], [0], [0], [0, 0, 1, 0], [], []>} : vector<8x16xf32>, vector<8x16xf32>, vector<8x8xf32> -> vector<8x8xf32>
    %22 = vector.broadcast %1 : vector<1x8xf32> to vector<8x8xf32>
    %23 = arith.addf %21, %22 : vector<8x8xf32>
    %c0_16 = arith.constant 0 : index
    %c1 = arith.constant 1 : index
    %c0_17 = arith.constant 0 : index
    %c0_18 = arith.constant 0 : index
    %24 = vector.load %arg5[%c0_16, %c1, %c0_17, %c0_18] : memref<1x3x8x8xf32, #tpu.memory_space<vmem>>, vector<1x1x8x8xf32>
    %25 = vector.shape_cast %24 : vector<1x1x8x8xf32> to vector<8x8xf32>
    %26 = vector.shape_cast %23 : vector<8x8xf32> to vector<1x1x8x8xf32>
    tpu.vector_store %arg5[%c0_16, %c1, %c0_17, %c0_18], %26 {strides = array<i32>} : memref<1x3x8x8xf32, #tpu.memory_space<vmem>>, vector<1x1x8x8xf32>,
    %27 = vector.extract_strided_slice %4 {offsets = [0, 2, 0], sizes = [16, 1, 16], strides = [1, 1, 1]} : vector<16x3x16xf32> to vector<16x1x16xf32>
    %28 = vector.shape_cast %27 : vector<16x1x16xf32> to vector<16x16xf32>
    %cst_19 = arith.constant dense<0.000000e+00> : vector<8x16xf32>
    %29 = tpu.matmul %0, %28, %cst_19 {dimension_numbers = #tpu.dot_dimension_numbers<[1], [1], [0], [0], [0, 0, 1, 0], [], []>} : vector<8x16xf32>, vector<16x16xf32>, vector<8x16xf32> -> vector<8x16xf32>
    %30 = vector.broadcast %2 : vector<8x1xf32> to vector<8x16xf32>
    %31 = arith.addf %29, %30 : vector<8x16xf32>
    %cst_20 = arith.constant dense<0.000000e+00> : vector<8x8xf32>
    %32 = tpu.matmul %31, %0, %cst_20 {dimension_numbers = #tpu.dot_dimension_numbers<[1], [1], [0], [0], [0, 0, 1, 0], [], []>} : vector<8x16xf32>, vector<8x16xf32>, vector<8x8xf32> -> vector<8x8xf32>
    %33 = vector.broadcast %1 : vector<1x8xf32> to vector<8x8xf32>
    %34 = arith.addf %32, %33 : vector<8x8xf32>
    %c0_21 = arith.constant 0 : index
    %c2 = arith.constant 2 : index
    %c0_22 = arith.constant 0 : index
    %c0_23 = arith.constant 0 : index
    %35 = vector.load %arg5[%c0_21, %c2, %c0_22, %c0_23] : memref<1x3x8x8xf32, #tpu.memory_space<vmem>>, vector<1x1x8x8xf32>
    %36 = vector.shape_cast %35 : vector<1x1x8x8xf32> to vector<8x8xf32>
    %37 = vector.shape_cast %34 : vector<8x8xf32> to vector<1x1x8x8xf32>
    tpu.vector_store %arg5[%c0_21, %c2, %c0_22, %c0_23], %37 {strides = array<i32>} : memref<1x3x8x8xf32, #tpu.memory_space<vmem>>, vector<1x1x8x8xf32>,
    return
  }
  func.func @transform_0(%arg0: i32) -> (i32, i32, i32, i32) {
    %c0_i32 = arith.constant 0 : i32
    %c0_i32_0 = arith.constant 0 : i32
    %c0_i32_1 = arith.constant 0 : i32
    %c0_i32_2 = arith.constant 0 : i32
    return %arg0, %c0_i32, %c0_i32_0, %c0_i32_1 : i32, i32, i32, i32
  }
  func.func @transform_1(%arg0: i32) -> (i32, i32) {
    %c0_i32 = arith.constant 0 : i32
    %c0_i32_0 = arith.constant 0 : i32
    %c0_i32_1 = arith.constant 0 : i32
    return %c0_i32, %c0_i32_0 : i32, i32
  }
  func.func @transform_2(%arg0: i32) -> (i32, i32) {
    %c0_i32 = arith.constant 0 : i32
    %c0_i32_0 = arith.constant 0 : i32
    %c0_i32_1 = arith.constant 0 : i32
    return %c0_i32, %c0_i32_0 : i32, i32
  }
  func.func @transform_3(%arg0: i32) -> (i32, i32) {
    %c0_i32 = arith.constant 0 : i32
    %c0_i32_0 = arith.constant 0 : i32
    %c0_i32_1 = arith.constant 0 : i32
    return %c0_i32, %c0_i32_0 : i32, i32
  }
  func.func @transform_4(%arg0: i32) -> (i32, i32, i32, i32) {
    %c0_i32 = arith.constant 0 : i32
    %c0_i32_0 = arith.constant 0 : i32
    %c0_i32_1 = arith.constant 0 : i32
    %c0_i32_2 = arith.constant 0 : i32
    return %arg0, %c0_i32, %c0_i32_0, %c0_i32_1 : i32, i32, i32, i32
  }
}

</mosaic_0001>

<bundles_post_ra>
// kernel: tpu_custom_call.1
= control target key start
LH: loop header
LB: loop body
LE: loop exit
PB: predicated region body
PF: predicated region fallthrough
CT: control target
= control target key end

     0   :  { %9 = vsyncpa [#allocation3], 0  ;;  %s1392_s0 = inlined_call_operand.vmem [shape: f32[2,16,3,16], index: 0, kind: input, shape index: {}]   ;;  %s1393_s1 = inlined_call_operand.vmem [shape: f32[8,16], index: 1, kind: input, shape index: {}]   ;;  %s1394_s2 = inlined_call_operand.vmem [shape: f32[1,8], index: 2, kind: input, shape index: {}]   ;;  %s1395_s3 = inlined_call_operand.vmem [shape: f32[8,1], index: 3, kind: input, shape index: {}]   ;;  %s1396_s4 = inlined_call_operand.hbm [shape: f32[2,3,8,8], index: 4, kind: output, shape index: {}]  }
   0x1   :  { %11 = vsyncpa [#allocation3 + $0x1], 0  ;;  %s1079_s15 = smov 0   ;;  %s1081_s16 = smov 0  }
   0x2   :  { %s1083_s17 = smov 0   ;;  %s1085_s18 = smov 0  }
   0x3 LB: > { %s1100_s19 = sadd.s32 4294967295, %s1046_s18   ;;  %s860_s20 = sadd.s32 4294967294, %s1046_s18   ;;  %s1046_s18 = sphi %s1085_s18, %s1402_s18   ;;  %s1042_s17 = sphi %s1083_s17, %s1401_s17   ;;  %s1038_s16 = sphi %s1081_s16, %s1400_s16   ;;  %s1034_s15 = sphi %s1079_s15, %s1399_s15  }
   0x4   : > { %s1104_s21 = sadd.s32 1, %s1046_s18   ;;  %s113_s22 = sadd.s32 1, %s1042_s17 }
   0x5   : > { %s110_s23 = ssub.s32 %s1046_s18, %s1104_s21  ;;  %p123_p0 = scmp.ne.s32.totalorder %s1042_s17, %s1038_s16 }
   0x6   : > { %p111_p1 = scmp.eq.s32.totalorder %s110_s23, 0  ;;  %p124_p2 = scmp.eq.s32.totalorder %s1100_s19, 1 }
   0x7   : > { %p129_p3 = scmp.ne.s32.totalorder %s1038_s16, %s1034_s15  ;;  %p130_p4 = scmp.eq.s32.totalorder %s860_s20, 1 }
   0x8   : > { %s1115_s24 = scalar_select %p111_p1, %s1042_s17, %s113_s22  }
   0x9   : > { %p1117_p5 = por %p124_p2, %p123_p0  ;;  %p1121_p6 = por %p130_p4, %p129_p3 }
   0xa   : > { %p863_p7 = scmp.ge.s32.totalorder %s1046_s18, 1  ;;  %p165_p8 = scmp.lt.s32.totalorder %s1046_s18, 3 }
   0xc   : > { %p166_p9 = pnand %p863_p7, %p165_p8 }
   0xd   : > { %p191_p10 = scmp.lt.s32.totalorder (!%p166_p9), %s1100_s19, 1  ;;  %s188_s10 = sand.u32 (!%p166_p9), 1, %s1038_s16  }
   0xe   : > { %169 = sbr.rel (%p166_p9) target bundleno = 851 (0x353), region = 36  ;;  %s1051_s30 = smov (!%p166_p9), [#allocation2]  }
   0xf   : > { %s939_s11 = smul.u32 (!%p166_p9), 24, %s188_s10  ;;  %s990_s5 = sshll.u32 (!%p166_p9), %s1051_s30, 4  ;;  %s991_s5 = int_to_ptr.vmem [resolvable:$false] %s990_s5 }
  0x10   : > { %s940_s20 = smul.u32 (!%p166_p9), 384, %s1100_s19 }
  0x11   : > { %s1311_s14 = scalar_lea.vmem (!%p166_p9), [#allocation2], %s939_s11 }
  0x12   : > { %s798_s22 = sshll.u32 (!%p166_p9), %s1311_s14, 4  ;;  %s1346_s28 = scalar_lea.hbm (!%p166_p9), %s1396_s4, %s940_s20  ;;  %s1341_s22 = int_to_ptr.vmem [resolvable:$true] %s798_s22 }
  0x13   : > { %v1048_v0 = vmov 0.0   ;;  %v198_v1 = vld [vmem:[%s1395_s3] sm:$0xff]  ;;  %s192_s29 = scalar_select %p191_p10, %s1100_s19, 1  ;;  %vm271_vm0 = vcmask 130048   ;;  %vm1049_vm1 = vmmov 0   ;;  %v1050_v3 = vmov 0  }
  0x14   : > { %903 = vmatprep.subr.mxu0 %v1048_v0  ;;  %910 = vmatprep.subr.mxu1 %v1048_v0  ;;  %v1139_v2 = vld [vmem:[%s1393_s1] sm:$0xff]  ;;  %vm237_vm2 = vcmask 1041409   ;;  %vm240_vm3 = vcmask 1042434   ;;  %vm243_vm4 = vcmask 1043459   ;;  %vm246_vm5 = vcmask 1044484   ;;  %s986_s19 = scalar_lea.vmem %s1341_s22, 384  ;;  %p993_p0 = scmp.lt.s32.totalorder %s1341_s22, %s991_s5 }
  0x15   : > { %907 = vmatprep.mubr.msk.f32.mxu0 %vm1049_vm1, %v1048_v0  ;;  %985 = vset.pattern.permute.xlu0 %v1050_v3  ;;  %s887_s6 = sshll.u32 %s192_s29, 6  ;;  %vm249_vm6 = vcmask 1045509   ;;  %vm252_vm7 = vcmask 1046534   ;;  %vm255_vm8 = vcmask 1047559   ;;  %vm428_vm9 = vcmask 64512   ;;  %s1352_s29 = scalar_lea.sflag [#allocation3], %s188_s10 }
  0x16   : > { %217 = vperm.xlu0 %985, %v198_v1   ;;  %911 = vmatpush3.xpose.msk.msra.mxu1 %vm271_vm0, %v1139_v2  ;;  %s1146_s9 = scalar_lea.vmem %s1392_s0, %s887_s6  ;;  %p987_p11 = scmp.ne.s32.totalorder %s1341_s22, %s986_s19 }
  0x17   : > { %912 = vmatprep.mubr.msk.f32.mxu1 %vm1049_vm1, %v1048_v0  ;;  %915 = vmatprep.subr.mxu1 %v1048_v0  ;;  %v1152_v4 = vld [vmem:[%s1146_s9 + $0x20] sm:$0x7]  ;;  %v1155_v5 = vld [vmem:[%s1146_s9 + $0x24] sm:$0x7]  ;;  %v1158_v6 = vld [vmem:[%s1146_s9 + $0x28] sm:$0x7] }
  0x18   : > { %v1161_v7 = vld [vmem:[%s1146_s9 + $0x2c] sm:$0x7]  ;;  %v1164_v8 = vld [vmem:[%s1146_s9 + $0x30] sm:$0x7]  ;;  %v1167_v9 = vld [vmem:[%s1146_s9 + $0x34] sm:$0x7]  ;;  %p988_p12 = pnand %p987_p11, %p1117_p5 }
  0x19   : > { %v1170_v10 = vld [vmem:[%s1146_s9 + $0x38] sm:$0x7]  ;;  %v257_v11 = vrot.slane %v1155_v5, 7  ;;  %v259_v12 = vrot.slane %v1158_v6, 6  ;;  %v1175_v13 = vld [vmem:[%s1146_s9 + $0x3c] sm:$0x7] }
  0x1a   : > { %v261_v14 = vrot.slane %v1161_v7, 5  ;;  %v263_v15 = vrot.slane %v1164_v8, 4  ;;  %v265_v17 = vrot.slane %v1167_v9, 3  ;;  %v267_v18 = vrot.slane %v1170_v10, 2  ;;  %v1184_v19 = vld [vmem:[%s1146_s9 + $0x4] sm:$0x7]  ;;  %p989_p13 = pneg %p988_p12 }
  0x1b   : > { %v258_v16 = vsel %vm237_vm2, %v257_v11, %v1152_v4  ;;  %v1188_v21 = vld [vmem:[%s1146_s9 + $0x8] sm:$0x7]  ;;  %v1191_v22 = vld [vmem:[%s1146_s9 + $0xc] sm:$0x7]  ;;  %v1194_v23 = vld [vmem:[%s1146_s9 + $0x10] sm:$0x7] }
  0x1c   : > { %v260_v20 = vsel %vm240_vm3, %v259_v12, %v258_v16  ;;  %v269_v25 = vrot.slane %v1175_v13, 1  ;;  %v1199_v26 = vld [vmem:[%s1146_s9] sm:$0x7]  ;;  %v1202_v27 = vld [vmem:[%s1146_s9 + $0x14] sm:$0x7]  ;;  %v236_v30 = vrot.slane %v1184_v19, 7 }
  0x1d   : > { %v262_v24 = vsel %vm243_vm4, %v261_v14, %v260_v20  ;;  %v1206_v29 = vld [vmem:[%s1146_s9 + $0x18] sm:$0x7]  ;;  %v239_v31 = vrot.slane %v1188_v21, 6  ;;  %v242_v32 = vrot.slane %v1191_v22, 5  ;;  %v1213_v34 = vld [vmem:[%s1146_s9 + $0x1c] sm:$0x7] }
  0x1e   : > { %v264_v28 = vsel %vm246_vm5, %v263_v15, %v262_v24  ;;  %v245_v35 = vrot.slane %v1194_v23, 4  ;;  %v238_v37 = vsel %vm237_vm2, %v236_v30, %v1199_v26  ;;  %v248_v38 = vrot.slane %v1202_v27, 3  ;;  %s992_s6 = scalar_lea.vmem %s991_s5, 768 }
  0x1f   : > { %v266_v33 = vsel %vm249_vm6, %v265_v17, %v264_v28  ;;  %v241_v40 = vsel %vm240_vm3, %v239_v31, %v238_v37  ;;  %v251_v41 = vrot.slane %v1206_v29, 2  ;;  %v254_v43 = vrot.slane %v1213_v34, 1  ;;  %p994_p1 = scmp.lt.s32.totalorder %s992_s6, %s986_s19 }
  0x20   : > { %v268_v36 = vsel %vm252_vm7, %v267_v18, %v266_v33  ;;  %v244_v42 = vsel %vm243_vm4, %v242_v32, %v241_v40  ;;  %v444_v48 = vrot.slane %v1152_v4, 1  ;;  %v446_v49 = vrot.slane %v1158_v6, 7 }
  0x21   : > { %v270_v39 = vsel %vm255_vm8, %v269_v25, %v268_v36  ;;  %v247_v44 = vsel %vm246_vm5, %v245_v35, %v244_v42  ;;  %v430_v50 = vrot.slane %v1199_v26, 1  ;;  %v448_v52 = vrot.slane %v1161_v7, 6  ;;  %p995_p2 = por %p994_p1, %p993_p0 }
  0x22   : > { %904 = vmatpush3.xpose.msk.msra.mxu0 %vm271_vm0, %v270_v39  ;;  %v250_v45 = vsel %vm249_vm6, %v248_v38, %v247_v44  ;;  %v445_v51 = vsel %vm237_vm2, %v1155_v5, %v444_v48  ;;  %v432_v54 = vrot.slane %v1188_v21, 7  ;;  %v450_v56 = vrot.slane %v1164_v8, 5 }
  0x23   : > { %905 = vmatprep.subr.mxu0 %v1048_v0  ;;  %v253_v46 = vsel %vm252_vm7, %v251_v41, %v250_v45  ;;  %v447_v53 = vsel %vm240_vm3, %v446_v49, %v445_v51  ;;  %v431_v55 = vsel %vm237_vm2, %v1184_v19, %v430_v50  ;;  %v434_v58 = vrot.slane %v1191_v22, 6  ;;  %p996_p3 = pnand %p995_p2, %p989_p13 }
  0x24   : > { %v256_v47 = vsel %vm255_vm8, %v254_v43, %v253_v46  ;;  %v449_v57 = vsel %vm243_vm4, %v448_v52, %v447_v53  ;;  %v433_v59 = vsel %vm240_vm3, %v432_v54, %v431_v55  ;;  %v452_v60 = vrot.slane %v1167_v9, 4 }
  0x25   : > { %v451_v61 = vsel %vm246_vm5, %v450_v56, %v449_v57  ;;  %v436_v62 = vrot.slane %v1194_v23, 5  ;;  %v435_v63 = vsel %vm243_vm4, %v434_v58, %v433_v59  ;;  %v454_v1 = vrot.slane %v1170_v10, 3 }
  0x26   : > { %906 = vmatpush3.xpose.msk.msra.mxu0 %vm271_vm0, %v256_v47  ;;  %v453_v3 = vsel %vm249_vm6, %v452_v60, %v451_v61  ;;  %v438_v11 = vrot.slane %v1202_v27, 4  ;;  %v456_v14 = vrot.slane %v1175_v13, 2  ;;  %v440_v17 = vrot.slane %v1206_v29, 3 }
  0x27   : > { %922 = vmatprep.subr.mxu0 %v1048_v0  ;;  %v437_v12 = vsel %vm246_vm5, %v436_v62, %v435_v63  ;;  %v455_v16 = vsel %vm252_vm7, %v454_v1, %v453_v3  ;;  %v442_v28 = vrot.slane %v1213_v34, 2  ;;  %v621_v33 = vrot.slane %v1152_v4, 2 }
  0x28   : > { %v439_v18 = vsel %vm249_vm6, %v438_v11, %v437_v12  ;;  %v457_v25 = vsel %vm255_vm8, %v456_v14, %v455_v16  ;;  %v622_v35 = vrot.slane %v1155_v5, 1  ;;  %v607_v36 = vrot.slane %v1199_v26, 2 }
  0x29   : > { %908 = vmatmul.mubr.msk.f32.vlgmr.msra.gmra.mxu0 %vm271_vm0, %v1139_v2  ;;  %v441_v31 = vsel %vm252_vm7, %v440_v17, %v439_v18  ;;  %v608_v38 = vrot.slane %v1184_v19, 1  ;;  %v625_v39 = vrot.slane %v1161_v7, 7  ;;  %v627_v4 = vrot.slane %v1164_v8, 6  ;;  %v869_v19 = vld [vmem:[%s1394_s2] ss:$0 sm:$0xff] }
  0x2a   : > { %923 = vmatpush3.xpose.msk.msra.mxu0 %vm271_vm0, %v1139_v2  ;;  %924 = vmatprep.mubr.msk.f32.mxu0 %vm1049_vm1, %v1048_v0  ;;  %v443_v32 = vsel %vm255_vm8, %v442_v28, %v441_v31  ;;  %v623_v37 = vsel %vm237_vm2, %v622_v35, %v621_v33  ;;  %v611_v26 = vrot.slane %v1191_v22, 7  ;;  %v629_v42 = vrot.slane %v1167_v9, 5 }
  0x2b   : > { %927 = vmatprep.subr.mxu0 %v1048_v0  ;;  %v624_v40 = vsel %vm240_vm3, %v1158_v6, %v623_v37  ;;  %v609_v41 = vsel %vm237_vm2, %v608_v38, %v607_v36  ;;  %v613_v44 = vrot.slane %v1194_v23, 6  ;;  %v631_v22 = vrot.slane %v1170_v10, 4 }
  0x2c   : > { %v626_v5 = vsel %vm243_vm4, %v625_v39, %v624_v40  ;;  %v610_v7 = vsel %vm240_vm3, %v1188_v21, %v609_v41  ;;  %v615_v9 = vrot.slane %v1202_v27, 5  ;;  %v633_v48 = vrot.slane %v1175_v13, 3 }
  0x2d   : > { %v628_v43 = vsel %vm246_vm5, %v627_v4, %v626_v5  ;;  %v612_v45 = vsel %vm243_vm4, %v611_v26, %v610_v7  ;;  %v617_v49 = vrot.slane %v1206_v29, 4  ;;  %v619_v53 = vrot.slane %v1213_v34, 3 }
  0x2e   : > { %v630_v21 = vsel %vm249_vm6, %v629_v42, %v628_v43  ;;  %v614_v47 = vsel %vm246_vm5, %v613_v44, %v612_v45 }
  0x2f   : > { %v632_v23 = vsel %vm252_vm7, %v631_v22, %v630_v21  ;;  %v616_v50 = vsel %vm249_vm6, %v615_v9, %v614_v47 }
  0x30   : > { %v634_v52 = vsel %vm255_vm8, %v633_v48, %v632_v23  ;;  %v618_v27 = vsel %vm252_vm7, %v617_v49, %v616_v50 }
  0x31   : > { %v620_v13 = vsel %vm255_vm8, %v619_v53, %v618_v27 }
  0x91   : > { %v1263_v15 = vpop.permute.xlu0 %217 }
  0xe9   : > { %v345_v20 = vpop.f32.mrf.mxu0 }
  0xea   : > { %v346_v24 = vadd.f32 %v345_v20, %v1263_v15 }
  0xeb   : > { %v909_v30 = vpop.f32.mrf.mxu0 }
  0xec   : > { %913 = vmatmul.mubr.msk.f32.vlgmr.msra.gmra.mxu1 %vm271_vm0, %v346_v24 }
  0xed   : > { %916 = vmatpush3.xpose.msk.msra.mxu1 %vm271_vm0, %v457_v25  ;;  %919 = vmatprep.mubr.msk.f32.mxu1 %vm1049_vm1, %v1048_v0 }
  0xee   : > { %917 = vmatprep.subr.mxu1 %v1048_v0 }
  0xf1   : > { %918 = vmatpush3.xpose.msk.msra.mxu1 %vm271_vm0, %v443_v32 }
  0xf2   : > { %934 = vmatprep.subr.mxu1 %v1048_v0 }
  0xf4   : > { %920 = vmatmul.mubr.msk.f32.vlgmr.msra.gmra.mxu1 %vm271_vm0, %v1139_v2 }
  0xf5   : > { %935 = vmatpush3.xpose.msk.msra.mxu1 %vm271_vm0, %v1139_v2  ;;  %936 = vmatprep.mubr.msk.f32.mxu1 %vm1049_vm1, %v1048_v0 }
 0x1ac   : > { %v424_v6 = vpop.f32.mrf.mxu1 }
 0x1ad   : > { %v425_v8 = vadd.f32 %v869_v19, %v424_v6 }
 0x1ae   : > { %v914_v46 = vpop.f32.mrf.mxu1 }
 0x1af   : > { %429 = vst.msk [vmem:[%s1311_s14] sm:$0xff] %vm428_vm9, %v425_v8 }
 0x1b4   : > { %v528_v10 = vpop.f32.mrf.mxu1 }
 0x1b5   : > { %v529_v51 = vadd.f32 %v528_v10, %v1263_v15 }
 0x1b6   : > { %v921_v54 = vpop.f32.mrf.mxu1 }
 0x1b7   : > { %925 = vmatmul.mubr.msk.f32.vlgmr.msra.gmra.mxu0 %vm271_vm0, %v529_v51 }
 0x1b8   : > { %928 = vmatpush3.xpose.msk.msra.mxu0 %vm271_vm0, %v634_v52  ;;  %931 = vmatprep.mubr.msk.f32.mxu0 %vm1049_vm1, %v1048_v0 }
 0x1b9   : > { %929 = vmatprep.subr.mxu0 %v1048_v0 }
 0x1bc   : > { %930 = vmatpush3.xpose.msk.msra.mxu0 %vm271_vm0, %v620_v13 }
 0x1bf   : > { %932 = vmatmul.mubr.msk.f32.vlgmr.msra.gmra.mxu0 %vm271_vm0, %v1139_v2 }
 0x277   : > { %v601_v29 = vpop.f32.mrf.mxu0 }
 0x278   : > { %v602_v34 = vadd.f32 %v869_v19, %v601_v29 }
 0x279   : > { %v926_v55 = vpop.f32.mrf.mxu0 }
 0x27a   : > { %877 = vst.msk [vmem:[%s1311_s14 + $0x8] sm:$0xff] %vm428_vm9, %v602_v34 }
 0x27f   : > { %v705_v56 = vpop.f32.mrf.mxu0 }
 0x280   : > { %v706_v57 = vadd.f32 %v705_v56, %v1263_v15 }
 0x281   : > { %v933_v58 = vpop.f32.mrf.mxu0 }
 0x282   : > { %937 = vmatmul.mubr.msk.f32.vlgmr.msra.gmra.mxu1 %vm271_vm0, %v706_v57 }
 0x342   : > { %v778_v0 = vpop.f32.mrf.mxu1 }
 0x343   : > { %v779_v2 = vadd.f32 %v869_v19, %v778_v0 }
 0x344   : > { %v938_v59 = vpop.f32.mrf.mxu1 }
 0x345   : > { %883 = vst.msk [vmem:[%s1311_s14 + $0x10] sm:$0xff] %vm428_vm9, %v779_v2 }
 0x346   : > { %999 = shalt.err (!%p996_p3)
}
 0x347   : > { %s1000_s7 = scalar_lea.hbm %s1346_s28, 384  ;;  %s1004_s10 = scalar_lea.hbm %s1396_s4, 768 }
 0x348   : > { %p1001_p4 = scmp.ne.s32.totalorder %s1346_s28, %s1000_s7  ;;  %p1005_p9 = scmp.lt.s32.totalorder %s1346_s28, %s1396_s4 }
 0x349   : > { %p1006_p10 = scmp.lt.s32.totalorder %s1004_s10, %s1000_s7 }
 0x34a   : > { %p1002_p7 = pnand %p1001_p4, %p1117_p5 }
 0x34b   : > { %p1007_p11 = por %p1006_p10, %p1005_p9 }
 0x34c   : > { %p1003_p8 = pneg %p1002_p7 }
 0x34e   : > { %p1008_p12 = pnand %p1007_p11, %p1003_p8 }
 0x350   : > { %1011 = shalt.err (!%p1008_p12)
}
 0x351   : > { %s1052_s13 = smov 128   ;;  %s1053_s14 = smov 8  }
 0x352   : > { %941 = dma.vmem_to_hbm [thread:$0]  (%p1117_p5), %s1341_s22, 384, %s1346_s28, %s1352_s29, %s1052_s13, %s1052_s13, %s1053_s14  }
 0x353 PF: > { %p947_p13 = scmp.ge.s32.totalorder %s1046_s18, 2  ;;  %s813_s20 = sand.u32 1, %s1034_s15  }
 0x354   : > { %s814_s23 = scalar_lea.sflag [#allocation3], %s813_s20 }
 0x355   : > { %p944_p0 = pnand %p947_p13, %p1121_p6 }
 0x357   : > { %p945_p1 = pneg %p944_p0 }
 0x359   : > { %1029 = dma.done.wait (%p945_p1), %s814_s23, 384  }
 0x35a   : > { %1031 = vsyncadd (%p945_p1), %s814_s23, 4294966912  ;;  %p14_p2 = scmp.ge.s32.totalorder %s1104_s21, 4   ;;  %s1399_s15 = smov %s1038_s16 }
 0x35b   : > { %s1400_s16 = smov %s1042_s17  ;;  %s1401_s17 = smov %s1115_s24 }
 0x35c   : > { %s1402_s18 = smov %s1104_s21  ;;  %16 = sbr.rel (!%p14_p2) target bundleno = 3 (0x3), region = 73 }
 0x361   :  { %819 = vsyncpa [#allocation3], 1 }
 0x362   :  { %821 = vsyncpa [#allocation3 + $0x1], 1 }

</bundles_post_ra>
